<compile_context>
chip_gen: v5e
topology: v5e:2x2
jax: 0.10.0
libtpu: 0.0.40
codegen_flags: <defaults>
</compile_context>

<pallas_src>
import jax
import jax.numpy as jnp
from jax.experimental import pallas as pl
from jax.experimental.pallas import tpu as pltpu


# --------------------------------------------------------------------------
# Kernel
# --------------------------------------------------------------------------
def patch_embedding_kernel(ids_ref,    # VMEM (bn, len_keep, 1) int32  kept-row indices
                           kp_ref,     # VMEM (bn, len_keep, K_pad)    kept patch rows
                           w_ref,      # VMEM (K_pad, E_pad)           Conv2d weight, pre-transposed
                           bias_ref,   # VMEM (1, E_pad)               Conv2d bias (f32)
                           pos_ref,    # VMEM (L, E_pad)               position_embeddings[0, 1:, :]
                           cls_ref,    # VMEM (1, E_pad)               cls_token + position_embeddings[0, :1, :]
                           o_ref):     # VMEM (bn, len_keep + 1, E_pad)
    bn, lk, _ = kp_ref.shape
    L, E = pos_ref.shape

    # Shared (block-invariant) operands: load once, hoisted out of the loop.
    w = w_ref[...]
    pos = pos_ref[...]
    bias = bias_ref[...]                                   # (1, E), f32

    # cls row (cls_token + pos[0]) for every sample in the block: ONE dense store.
    o_ref[:, pl.ds(0, 1), :] = jnp.broadcast_to(
        cls_ref[...][None], (bn, 1, E)).astype(o_ref.dtype)

    # Lane iota over the L axis, hoisted out of the per-sample loop.
    lane = jax.lax.broadcasted_iota(jnp.int32, (lk, L), 1)

    # Statically unrolled loop over the (small) batch block.  Each iteration is
    # two well-shaped 2-D MXU matmuls + one dense (lk, E) slab store — no
    # per-row dynamic slices, no masked (1, E) stores, no VMEM scratch.
    for b in range(bn):
        # (1) Projection of ONLY the kept patch rows.
        proj = jnp.dot(kp_ref[b], w, preferred_element_type=jnp.float32)      # (lk, E) f32
        # (2) Position-embedding gather for the kept rows as a one-hot matmul.
        sel = (lane == ids_ref[b]).astype(pos.dtype)                          # (lk, L) one-hot
        pos_k = jnp.dot(sel, pos, preferred_element_type=jnp.float32)         # (lk, E) f32
        # (3) bias + pos add in f32, then ONE lane-dense slab store per sample.
        o_ref[b, pl.ds(1, lk), :] = (proj + bias + pos_k).astype(o_ref.dtype)
    # (4) Dropout is the identity in inference mode.
    # TODO(synk): training-mode dropout would use pltpu.prng_seed / prng_random_bits.


# --------------------------------------------------------------------------
# Wrapper-side helpers (layout plumbing + masking index math)
# --------------------------------------------------------------------------
def _round_up(x, m):
    return (x + m - 1) // m * m


def random_masking_ids(key, N, L, mask_ratio):
    """Same math as PatchEmbedding.random_masking, index/mask part only."""
    len_keep = int(L * (1 - mask_ratio))
    noise = jax.random.uniform(key, (N, L))
    ids_shuffle = jnp.argsort(noise, axis=1).astype(jnp.int32)
    ids_restore = jnp.argsort(ids_shuffle, axis=1).astype(jnp.int32)
    ids_keep = ids_shuffle[:, :len_keep]
    # mask = gather([0]*len_keep + [1]*(L-len_keep), ids_restore)
    mask = (ids_restore >= len_keep).astype(jnp.float32)
    return ids_keep, ids_restore, mask, len_keep


def extract_patches(x, patch_size):
    """(N, C, H, W) -> (N, L, C*P*P) matching Conv2d(stride=P) + flatten(2).transpose(1,2)."""
    N, C, H, W = x.shape
    P = patch_size
    Hp, Wp = H // P, W // P
    p = x.reshape(N, C, Hp, P, Wp, P)
    p = p.transpose(0, 2, 4, 1, 3, 5)            # (N, Hp, Wp, C, P, P)
    return p.reshape(N, Hp * Wp, C * P * P)      # (N, L, K)


def _pick_batch_block(N, len_keep, K_pad, E_pad, in_itemsize,
                      vmem_budget_bytes=24 * 1024 * 1024, max_bn=32):
    """Largest bn dividing N s.t. grid >= min(4, N) and the per-step (double-
    buffered) VMEM footprint stays under budget (sized for v7x's 64 MiB)."""
    def per_step_bytes(bn):
        kept = 2 * bn * len_keep * K_pad * in_itemsize        # pipelined input
        out = 2 * bn * (len_keep + 1) * E_pad * 4             # pipelined output
        ids = 2 * bn * _round_up(len_keep, 8) * 128 * 4       # padded ids block (tiny)
        return kept + out + ids

    min_grid = min(4, N) if N > 1 else 1
    best = 1
    for bn in range(1, min(N, max_bn) + 1):
        if N % bn:
            continue
        if N // bn < min_grid:
            continue
        if per_step_bytes(bn) <= vmem_budget_bytes:
            best = bn
    return best


# --------------------------------------------------------------------------
# Forward pass
# --------------------------------------------------------------------------
def patch_embedding_forward(x, conv_w, conv_b, cls_token, pos_emb, mask_ratio, key,
                            *, batch_block=None, compute_dtype=None):
    N, C, H, W = x.shape
    E, _, P, _ = conv_w.shape
    L = (H // P) * (W // P)
    K = C * P * P
    out_dtype = x.dtype
    compute_dtype = compute_dtype if compute_dtype is not None else x.dtype

    # Masking indices (noise + double argsort): plain JAX, no clean Pallas equivalent.
    ids_keep, ids_restore, mask, len_keep = random_masking_ids(key, N, L, mask_ratio)

    # Patchify (layout plumbing) and gather the KEPT rows *before* projection —
    # the projection is row-wise so this is mathematically identical and saves
    # 4x MXU flops / patch DMA at mask_ratio = 0.75.
    patches = extract_patches(x, P)                                        # (N, L, K)
    idx = jnp.broadcast_to(ids_keep[:, :, None], (N, len_keep, K))
    kept = jnp.take_along_axis(patches, idx, axis=1)                       # (N, len_keep, K)

    # Lane padding: contraction dim K and embedding dim E up to multiples of 128
    # so MXU tiles are fed full-width and every output store is lane-dense.
    # (No-op at ViT-MAE shapes where K = E = 768.)
    Kp = _round_up(K, 128)
    Ep = _round_up(E, 128)
    kept = jnp.pad(kept, ((0, 0), (0, 0), (0, Kp - K))).astype(compute_dtype)
    w_mat = jnp.pad(conv_w.reshape(E, K).T,
                    ((0, Kp - K), (0, Ep - E))).astype(compute_dtype)      # (Kp, Ep)
    bias = jnp.pad(conv_b.reshape(1, E), ((0, 0), (0, Ep - E))).astype(jnp.float32)
    pos_patches = jnp.pad(pos_emb[0, 1:, :], ((0, 0), (0, Ep - E))).astype(jnp.float32)
    cls_row = jnp.pad(cls_token[0] + pos_emb[0, :1, :],
                      ((0, 0), (0, Ep - E))).astype(jnp.float32)           # (1, Ep)
    ids3 = ids_keep[:, :, None].astype(jnp.int32)                          # (N, len_keep, 1)

    bn = batch_block if batch_block is not None else _pick_batch_block(
        N, len_keep, Kp, Ep, jnp.dtype(compute_dtype).itemsize)
    assert N % bn == 0 and (N // bn >= 2 or N == 1), "grid must have >= 2 steps"

    out_padded = pl.pallas_call(
        patch_embedding_kernel,
        out_shape=jax.ShapeDtypeStruct((N, len_keep + 1, Ep), out_dtype),
        grid=(N // bn,),
        in_specs=[
            pl.BlockSpec((bn, len_keep, 1), lambda n: (n, 0, 0)),     # ids_keep block
            pl.BlockSpec((bn, len_keep, Kp), lambda n: (n, 0, 0)),    # kept patches
            # NOTE(v6e/v5e): if the patch DMA is still exposed in the trace, add
            # pipeline_mode=pl.Buffered(3) here (skip on v7x — VMEM is tight).
            pl.BlockSpec((Kp, Ep), lambda n: (0, 0)),                 # projection weight
            pl.BlockSpec((1, Ep), lambda n: (0, 0)),                  # projection bias
            pl.BlockSpec((L, Ep), lambda n: (0, 0)),                  # pos emb (patch rows)
            pl.BlockSpec((1, Ep), lambda n: (0, 0)),                  # cls + pos[0] row
        ],
        out_specs=pl.BlockSpec((bn, len_keep + 1, Ep), lambda n: (n, 0, 0)),
        compiler_params=pltpu.CompilerParams(
            dimension_semantics=("parallel",),          # batch blocks are independent
            vmem_limit_bytes=48 * 1024 * 1024,          # explicit (v5e default is 16 MiB)
        ),
    )(ids3, kept, w_mat, bias, pos_patches, cls_row)

    return out_padded[:, :, :E], mask, ids_restore


# --------------------------------------------------------------------------
# Plain-JAX reference (replica of PatchEmbedding.forward, inference dropout)
# --------------------------------------------------------------------------
def reference_forward(x, conv_w, conv_b, cls_token, pos_emb, mask_ratio, key):
    N, C, H, W = x.shape
    E, _, P, _ = conv_w.shape
    L = (H // P) * (W // P)

    y = jax.lax.conv_general_dilated(
        x, conv_w, window_strides=(P, P), padding="VALID",
        dimension_numbers=("NCHW", "OIHW", "NCHW"),
        precision=jax.lax.Precision.HIGHEST)
    y = y + conv_b[None, :, None, None]
    y = y.reshape(N, E, L).transpose(0, 2, 1)            # (N, L, E)
    y = y + pos_emb[:, 1:, :]

    ids_keep, ids_restore, mask, len_keep = random_masking_ids(key, N, L, mask_ratio)
    idx = jnp.broadcast_to(ids_keep[:, :, None], (N, len_keep, E))
    x_masked = jnp.take_along_axis(y, idx, axis=1)

    cls = jnp.broadcast_to(cls_token + pos_emb[:, :1, :], (N, 1, E))
    out = jnp.concatenate([cls, x_masked], axis=1)
    return out, mask, ids_restore


if __name__ == "__main__":
    # Small shapes consistent with the module:
    # batch=2, channels=4, image 16x16, patch 4 -> 16 patches, embed_size=32
    N, C, IMG, P, E = 2, 4, 16, 4, 32
    mask_ratio = 0.75
    dropout = 0.1            # defined in the module; identity at inference

    key = jax.random.PRNGKey(0)
    kx, kw, kb, kc, kp, kmask = jax.random.split(key, 6)

    x = jax.random.normal(kx, (N, C, IMG, IMG), dtype=jnp.float32)
    conv_w = jax.random.normal(kw, (E, C, P, P), dtype=jnp.float32) * 0.02
    conv_b = jax.random.normal(kb, (E,), dtype=jnp.float32) * 0.02
    cls_token = jax.random.normal(kc, (1, 1, E), dtype=jnp.float32)
    L = (IMG // P) ** 2
    pos_emb = jax.random.normal(kp, (1, L + 1, E), dtype=jnp.float32)

    out, mask, ids_restore = patch_embedding_forward(
        x, conv_w, conv_b, cls_token, pos_emb, mask_ratio, kmask)
    out = jax.block_until_ready(out)

    ref_out, ref_mask, ref_ids = reference_forward(
        x, conv_w, conv_b, cls_token, pos_emb, mask_ratio, kmask)

    len_keep = int(L * (1 - mask_ratio))
    assert out.shape == (N, len_keep + 1, E)
    assert mask.shape == (N, L) and ids_restore.shape == (N, L)
    assert jnp.allclose(out, ref_out, atol=1e-4, rtol=1e-4), "x mismatch vs reference"
    assert jnp.array_equal(mask, ref_mask), "mask mismatch vs reference"
    assert jnp.array_equal(ids_restore, ref_ids), "ids_restore mismatch vs reference"

    print("KERNEL_OK")
</pallas_src>

<mosaic_0001>
module attributes {stable_mosaic.version = 11 : i64} {
  func.func @patch_embedding_kernel(%arg0: i32, %arg1: memref<1x4x1xi32, #tpu.memory_space<vmem>>, %arg2: memref<1x4x128xf32, #tpu.memory_space<vmem>>, %arg3: memref<128x128xf32, #tpu.memory_space<vmem>>, %arg4: memref<1x128xf32, #tpu.memory_space<vmem>>, %arg5: memref<16x128xf32, #tpu.memory_space<vmem>>, %arg6: memref<1x128xf32, #tpu.memory_space<vmem>>, %arg7: memref<1x5x128xf32, #tpu.memory_space<vmem>>) attributes {dimension_semantics = [#tpu.dimension_semantics<parallel>], iteration_bounds = array<i64: 2>, scalar_prefetch = 0 : i64, scratch_operands = 0 : i64, tpu.core_type = #tpu.core_type<tc>, window_params = [{transform_indices = @transform_0, window_bounds = array<i64: 1, 4, 1>}, {transform_indices = @transform_1, window_bounds = array<i64: 1, 4, 128>}, {pipeline_mode = #tpu.pipeline_mode<synchronous>, transform_indices = @transform_2, window_bounds = array<i64: 128, 128>}, {pipeline_mode = #tpu.pipeline_mode<synchronous>, transform_indices = @transform_3, window_bounds = array<i64: 1, 128>}, {pipeline_mode = #tpu.pipeline_mode<synchronous>, transform_indices = @transform_4, window_bounds = array<i64: 16, 128>}, {pipeline_mode = #tpu.pipeline_mode<synchronous>, transform_indices = @transform_5, window_bounds = array<i64: 1, 128>}, {transform_indices = @transform_6, window_bounds = array<i64: 1, 5, 128>}]} {
    %c0 = arith.constant 0 : index
    %c0_0 = arith.constant 0 : index
    %0 = vector.load %arg3[%c0, %c0_0] : memref<128x128xf32, #tpu.memory_space<vmem>>, vector<128x128xf32>
    %c0_1 = arith.constant 0 : index
    %c0_2 = arith.constant 0 : index
    %1 = vector.load %arg5[%c0_1, %c0_2] : memref<16x128xf32, #tpu.memory_space<vmem>>, vector<16x128xf32>
    %c0_3 = arith.constant 0 : index
    %c0_4 = arith.constant 0 : index
    %2 = vector.load %arg4[%c0_3, %c0_4] : memref<1x128xf32, #tpu.memory_space<vmem>>, vector<1x128xf32>
    %c0_5 = arith.constant 0 : index
    %c0_6 = arith.constant 0 : index
    %3 = vector.load %arg6[%c0_5, %c0_6] : memref<1x128xf32, #tpu.memory_space<vmem>>, vector<1x128xf32>
    %4 = vector.shape_cast %3 : vector<1x128xf32> to vector<1x1x128xf32>
    %c0_7 = arith.constant 0 : index
    %c0_8 = arith.constant 0 : index
    %c0_9 = arith.constant 0 : index
    %5 = vector.load %arg7[%c0_7, %c0_8, %c0_9] : memref<1x5x128xf32, #tpu.memory_space<vmem>>, vector<1x1x128xf32>
    tpu.vector_store %arg7[%c0_7, %c0_8, %c0_9], %4 {strides = array<i32>} : memref<1x5x128xf32, #tpu.memory_space<vmem>>, vector<1x1x128xf32>,
    %6 = tpu.iota {dimensions = array<i32: 1>} : vector<4x16xi32>
    %c0_10 = arith.constant 0 : index
    %c0_11 = arith.constant 0 : index
    %c0_12 = arith.constant 0 : index
    %7 = vector.load %arg2[%c0_10, %c0_11, %c0_12] : memref<1x4x128xf32, #tpu.memory_space<vmem>>, vector<1x4x128xf32>
    %8 = vector.shape_cast %7 : vector<1x4x128xf32> to vector<4x128xf32>
    %cst = arith.constant dense<0.000000e+00> : vector<4x128xf32>
    %9 = tpu.matmul %8, %0, %cst {dimension_numbers = #tpu.dot_dimension_numbers<[1], [0], [0], [1], [0, 0, 1, 1], [], []>} : vector<4x128xf32>, vector<128x128xf32>, vector<4x128xf32> -> vector<4x128xf32>
    %c0_13 = arith.constant 0 : index
    %c0_14 = arith.constant 0 : index
    %c0_15 = arith.constant 0 : index
    %10 = vector.load %arg1[%c0_13, %c0_14, %c0_15] : memref<1x4x1xi32, #tpu.memory_space<vmem>>, vector<1x4x1xi32>
    %11 = vector.shape_cast %10 : vector<1x4x1xi32> to vector<4x1xi32>
    %12 = vector.broadcast %11 : vector<4x1xi32> to vector<4x16xi32>
    %13 = arith.cmpi eq, %6, %12 : vector<4x16xi32>
    %14 = arith.extui %13 : vector<4x16xi1> to vector<4x16xi32>
    %15 = arith.sitofp %14 : vector<4x16xi32> to vector<4x16xf32>
    %cst_16 = arith.constant dense<0.000000e+00> : vector<4x128xf32>
    %16 = tpu.matmul %15, %1, %cst_16 {dimension_numbers = #tpu.dot_dimension_numbers<[1], [0], [0], [1], [0, 0, 1, 1], [], []>} : vector<4x16xf32>, vector<16x128xf32>, vector<4x128xf32> -> vector<4x128xf32>
    %17 = vector.broadcast %2 : vector<1x128xf32> to vector<4x128xf32>
    %18 = arith.addf %9, %17 : vector<4x128xf32>
    %19 = arith.addf %18, %16 : vector<4x128xf32>
    %c0_17 = arith.constant 0 : index
    %c1 = arith.constant 1 : index
    %c0_18 = arith.constant 0 : index
    %20 = vector.load %arg7[%c0_17, %c1, %c0_18] : memref<1x5x128xf32, #tpu.memory_space<vmem>>, vector<1x4x128xf32>
    %21 = vector.shape_cast %20 : vector<1x4x128xf32> to vector<4x128xf32>
    %22 = vector.shape_cast %19 : vector<4x128xf32> to vector<1x4x128xf32>
    tpu.vector_store %arg7[%c0_17, %c1, %c0_18], %22 {strides = array<i32>} : memref<1x5x128xf32, #tpu.memory_space<vmem>>, vector<1x4x128xf32>,
    return
  }
  func.func @transform_0(%arg0: i32) -> (i32, i32, i32) {
    %c0_i32 = arith.constant 0 : i32
    %c0_i32_0 = arith.constant 0 : i32
    %c0_i32_1 = arith.constant 0 : i32
    return %arg0, %c0_i32, %c0_i32_0 : i32, i32, i32
  }
  func.func @transform_1(%arg0: i32) -> (i32, i32, i32) {
    %c0_i32 = arith.constant 0 : i32
    %c0_i32_0 = arith.constant 0 : i32
    %c0_i32_1 = arith.constant 0 : i32
    return %arg0, %c0_i32, %c0_i32_0 : i32, i32, i32
  }
  func.func @transform_2(%arg0: i32) -> (i32, i32) {
    %c0_i32 = arith.constant 0 : i32
    %c0_i32_0 = arith.constant 0 : i32
    %c0_i32_1 = arith.constant 0 : i32
    return %c0_i32, %c0_i32_0 : i32, i32
  }
  func.func @transform_3(%arg0: i32) -> (i32, i32) {
    %c0_i32 = arith.constant 0 : i32
    %c0_i32_0 = arith.constant 0 : i32
    %c0_i32_1 = arith.constant 0 : i32
    return %c0_i32, %c0_i32_0 : i32, i32
  }
  func.func @transform_4(%arg0: i32) -> (i32, i32) {
    %c0_i32 = arith.constant 0 : i32
    %c0_i32_0 = arith.constant 0 : i32
    %c0_i32_1 = arith.constant 0 : i32
    return %c0_i32, %c0_i32_0 : i32, i32
  }
  func.func @transform_5(%arg0: i32) -> (i32, i32) {
    %c0_i32 = arith.constant 0 : i32
    %c0_i32_0 = arith.constant 0 : i32
    %c0_i32_1 = arith.constant 0 : i32
    return %c0_i32, %c0_i32_0 : i32, i32
  }
  func.func @transform_6(%arg0: i32) -> (i32, i32, i32) {
    %c0_i32 = arith.constant 0 : i32
    %c0_i32_0 = arith.constant 0 : i32
    %c0_i32_1 = arith.constant 0 : i32
    return %arg0, %c0_i32, %c0_i32_0 : i32, i32, i32
  }
}

</mosaic_0001>

<bundles_post_ra>
// kernel: tpu_custom_call.1
= control target key start
LH: loop header
LB: loop body
LE: loop exit
PB: predicated region body
PF: predicated region fallthrough
CT: control target
= control target key end

     0   :  { %11 = vsyncpa [#allocation3], 0  ;;  %s690_s0 = inlined_call_operand.vmem [shape: s32[2,4,1], index: 0, kind: input, shape index: {}]   ;;  %s691_s1 = inlined_call_operand.vmem [shape: f32[2,4,128], index: 1, kind: input, shape index: {}]   ;;  %s692_s2 = inlined_call_operand.hbm [shape: f32[128,128], index: 2, kind: input, shape index: {}]   ;;  %s693_s3 = inlined_call_operand.vmem [shape: f32[1,128], index: 3, kind: input, shape index: {}]   ;;  %s694_s4 = inlined_call_operand.hbm [shape: f32[16,128], index: 4, kind: input, shape index: {}]   ;;  %s695_s5 = inlined_call_operand.vmem [shape: f32[1,128], index: 5, kind: input, shape index: {}]   ;;  %s696_s6 = inlined_call_operand.vmem [shape: f32[2,5,128], index: 6, kind: output, shape index: {}]  }
   0x1   :  { %12 = vsyncpa [#allocation5], 0  ;;  %s633_s21 = smov 0  }
   0x2 LB: > { %s196_s24 = sshll.u32 %s692_s2, 4  ;;  %s465_s25 = sadd.s32 4294967295, %s590_s21   ;;  %s590_s21 = sphi %s633_s21, %s18_s21   ;;  %s197_s24 = int_to_ptr.hbm [resolvable:$true] %s196_s24 }
   0x3   : > { %p467_p0 = scmp.ge.s32.totalorder %s590_s21, 1  ;;  %p185_p1 = scmp.lt.s32.totalorder %s590_s21, 3 }
   0x4   : > { %p496_p2 = scmp.eq.s32.totalorder %s465_s25, 0  ;;  %s592_s27 = smov [#allocation2]  }
   0x5   : > { %p644_p3 = pnand %p467_p0, %p185_p1  ;;  %s198_s28 = sshll.u32 %s592_s27, 4  ;;  %s199_s28 = int_to_ptr.vmem [resolvable:$true] %s198_s28 }
   0x6   : > { %s213_s7 = sshll.u32 %s694_s4, 4  ;;  %s593_s8 = smov [#allocation4]   ;;  %s214_s7 = int_to_ptr.hbm [resolvable:$true] %s213_s7 }
   0x7   : > { %p489_p4 = pneg %p644_p3  ;;  %s215_s9 = sshll.u32 %s593_s8, 4  ;;  %s216_s9 = int_to_ptr.vmem [resolvable:$true] %s215_s9 }
   0x8   : > { %s594_s10 = smov 128   ;;  %s595_s11 = smov 8  }
   0x9   : > { %p490_p5 = pnand %p496_p2, %p489_p4  ;;  %248 = sbr.rel (%p644_p3) target bundleno = 269 (0x10d), region = 44 }
   0xb   : > { %492 = dma.hbm_to_vmem [thread:$0]  (!%p490_p5), %s197_s24, 2048, %s199_s28, [#allocation3], %s594_s10, %s594_s10, %s595_s11  }
   0xc   : > { %495 = dma.hbm_to_vmem [thread:$0]  (!%p490_p5), %s214_s7, 256, %s216_s9, [#allocation5], %s594_s10, %s594_s10, %s595_s11  }
   0xe   : > { %581 = dma.done.wait (%p496_p2), [#allocation3], 2048  }
   0xf   : > { %583 = vsyncadd (%p496_p2), [#allocation3], 4294965248 }
  0x10   : > { %585 = dma.done.wait (%p496_p2), [#allocation5], 256  }
  0x11   : > { %587 = vsyncadd (%p496_p2), [#allocation5], 4294967040  ;;  %p286_p6 = scmp.lt.s32.totalorder %s465_s25, 1  ;;  %v596_v0 = vmov 0   ;;  %v317_v2 = vld [vmem:[%s695_s5] sm:$0x1]  ;;  %v319_v22 = vlaneseq }
  0x12   : > { %514 = vset.pattern.permute.xlu0 %v596_v0  ;;  %v313_v3 = vld [vmem:[#allocation2 + $0x78] sm:$0xff]  ;;  %v312_v4 = vld [vmem:[#allocation2 + $0x70] sm:$0xff]  ;;  %v311_v5 = vld [vmem:[#allocation2 + $0x68] sm:$0xff]  ;;  %vm329_vm0 = vcmask 130048   ;;  %v597_v25 = vmov 0.0  }
  0x13   : > { %s699_s25 = smov (!%p286_p6, %s465_s25), 1  ;;  %356 = vmatpush.msra.mxu1 %v313_v3  ;;  %v310_v6 = vld [vmem:[#allocation2 + $0x60] sm:$0xff]  ;;  %v309_v7 = vld [vmem:[#allocation2 + $0x58] sm:$0xff]  ;;  %v308_v8 = vld [vmem:[#allocation2 + $0x50] sm:$0xff]  ;;  %v320_v23 = vand.u32 127, %v319_v22 }
  0x14   : > { %s474_s12 = sshll.u32 %s699_s25, 2  ;;  %s476_s13 = sshll.u32 %s699_s25, 3  ;;  %v307_v9 = vld [vmem:[#allocation2 + $0x48] sm:$0xff]  ;;  %v306_v10 = vld [vmem:[#allocation2 + $0x40] sm:$0xff]  ;;  %v305_v11 = vld [vmem:[#allocation2 + $0x38] sm:$0xff] }
  0x15   : > { %s289_s16 = scalar_lea.vmem %s690_s0, %s474_s12  ;;  %s672_s19 = scalar_lea.vmem %s696_s6, %s476_s13  ;;  %357 = vmatpush.msra.mxu1 %v312_v4  ;;  %v304_v12 = vld [vmem:[#allocation2 + $0x30] sm:$0xff]  ;;  %v303_v13 = vld [vmem:[#allocation2 + $0x28] sm:$0xff]  ;;  %v302_v14 = vld [vmem:[#allocation2 + $0x20] sm:$0xff] }
  0x16   : > { %v322_v1 = vld [vmem:[%s289_s16] sm:$0xf]  ;;  %318 = vst [vmem:[%s672_s19] sm:$0x1] %v317_v2  ;;  %v301_v15 = vld [vmem:[#allocation2 + $0x18] sm:$0xff]  ;;  %v300_v16 = vld [vmem:[#allocation2 + $0x10] sm:$0xff]  ;;  %s293_s26 = scalar_lea.vmem %s691_s1, %s474_s12 }
  0x17   : > { %324 = vperm.xlu0 %514, %v322_v1   ;;  %358 = vmatpush.msra.mxu1 %v311_v5  ;;  %v299_v17 = vld [vmem:[#allocation2 + $0x8] sm:$0xff]  ;;  %v298_v19 = vld [vmem:[#allocation2] sm:$0xff] }
  0x18   : > { %v315_v18 = vld [vmem:[#allocation4 + $0x8] sm:$0xff]  ;;  %v321_v20 = vld [vmem:[%s293_s26] sm:$0xf] }
  0x19   : > { %359 = vmatpush.msra.mxu1 %v310_v6  ;;  %347 = vmatpush.msra.mxu0 %v315_v18  ;;  %v314_v21 = vld [vmem:[#allocation4] sm:$0xff] }
  0x1a   : > { %v515_v27 = vld [vmem:[%s693_s3] ss:$0 sm:$0xff] }
  0x1b   : > { %360 = vmatpush.msra.mxu1 %v309_v7  ;;  %348 = vmatpush.msra.mxu0 %v314_v21 }
  0x1d   : > { %361 = vmatpush.msra.mxu1 %v308_v8 }
  0x1f   : > { %362 = vmatpush.msra.mxu1 %v307_v9 }
  0x21   : > { %363 = vmatpush.msra.mxu1 %v306_v10 }
  0x23   : > { %364 = vmatpush.msra.mxu1 %v305_v11 }
  0x25   : > { %365 = vmatpush.msra.mxu1 %v304_v12 }
  0x27   : > { %366 = vmatpush.msra.mxu1 %v303_v13 }
  0x29   : > { %367 = vmatpush.msra.mxu1 %v302_v14 }
  0x2b   : > { %368 = vmatpush.msra.mxu1 %v301_v15 }
  0x2d   : > { %369 = vmatpush.msra.mxu1 %v300_v16 }
  0x2f   : > { %370 = vmatpush.msra.mxu1 %v299_v17 }
  0x31   : > { %371 = vmatpush.msra.mxu1 %v298_v19 }
  0x32   : > { %372 = vmatmul.f32.vlgmr.msra.gmra.mxu1 %v321_v20 }
  0x89   : > { %v325_v24 = vpop.permute.xlu0 %324 }
  0x8a   : > { %vm326_vm1 = vcmp.eq.s32.totalorder %v320_v23, %v325_v24 }
  0x8b   : > { %v477_v26 = vsel %vm326_vm1, 1.0, %v597_v25 }
  0x8c   : > { %478 = vmatmul.msk.f32.vlgmr.msra.gmra.mxu0 %vm329_vm0, %v477_v26 }
  0xaf   : > { %v373_v28 = vpop.f32.mrf.mxu1 }
  0xb0   : > { %v374_v29 = vadd.f32 %v515_v27, %v373_v28 }
 0x109   : > { %v350_v30 = vpop.f32.mrf.mxu0 }
 0x10a   : > { %v376_v31 = vadd.f32 %v374_v29, %v350_v30 }
 0x10c   : > { %377 = vst [vmem:[%s672_s19 + $0x1] sm:$0xf] %v376_v31 }
 0x10d PF: > { %s18_s21 = sadd.s32 1, %s590_s21  }
 0x10e   : > { %p15_p7 = scmp.ge.s32.totalorder %s18_s21, 4  }
 0x110   :  { %17 = sbr.rel (!%p15_p7) target bundleno = 2 (0x2), region = 86 }
 0x115   :  { %397 = vsyncpa [#allocation3], 1 }
 0x116   :  { %399 = vsyncpa [#allocation3 + $0x1], 1 }
 0x117   :  { %400 = vsyncpa [#allocation5], 1 }

</bundles_post_ra>
